<compile_context>
chip_gen: v5e
topology: v5e:2x2
jax: 0.10.0
libtpu: 0.0.40
codegen_flags: <defaults>
</compile_context>

<pallas_src>
import functools

import jax
import jax.numpy as jnp
from jax import lax
from jax.experimental import pallas as pl
from jax.experimental.pallas import tpu as pltpu

ALPHA = 1.0
GAMMA = 2.0
REDUCTION = "mean"  # 'mean' or 'sum'


def _round_up(x, m):
    return ((x + m - 1) // m) * m


def _choose_tile_n(n, c, itemsize):
    """Pick the batch tile from byte budgets instead of a fixed row count."""
    target_block_bytes = 2 << 20        # ~2 MiB streamed logits block
    vmem_budget_bytes = 26 << 20        # conservative: fits v7x 64 MiB/TC
    stream_row = max(c * itemsize, 1)                  # bytes/row on the HBM stream
    live_row = max(c * (2 * itemsize + 6 * 4), 1)      # 2x dbl-buf + ~6 f32 temps
    tile = min(target_block_bytes // stream_row,
               vmem_budget_bytes // live_row,
               4096)
    tile = max(tile, 8)
    if tile >= 32:
        tile = (tile // 32) * 32
    # Tiny batches: a single block, no bigger than the rounded-up batch.
    tile = min(tile, _round_up(n, 32))
    return max(8, (tile // 8) * 8)


def _focal_loss_kernel(logits_ref, targets_ref, out_ref, *,
                       n_valid, tile_n, alpha, gamma):
    pid = pl.program_id(0)

    x = logits_ref[...].astype(jnp.float32)            # (tile_n, C)
    tgt = targets_ref[...]                              # (tile_n, 1) int32
    tn, c = x.shape

    # Numerically stable log-sum-exp: 3 cross-lane reductions total.
    m = jnp.max(x, axis=1, keepdims=True)               # (tile_n, 1)
    z = x - m
    ez = jnp.exp(z)                                      # single per-element exp
    sumexp = jnp.sum(ez, axis=1, keepdims=True)          # (tile_n, 1)

    # Gather the target logit with one select + one reduction.
    col_ids = lax.broadcasted_iota(jnp.int32, (tn, c), 1)
    z_t = jnp.sum(jnp.where(col_ids == tgt, z, 0.0), axis=1, keepdims=True)

    ce = jnp.log(sumexp) - z_t                           # -log_softmax[target]
    p = jnp.exp(-ce)                                     # (tile_n,1) exp on EUP
    q = 1.0 - p
    if float(gamma) == 2.0:
        mod = q * q                                      # plain VPU multiply
    elif float(gamma) == int(gamma) and gamma >= 0:
        mod = lax.integer_pow(q, int(gamma))
    else:
        mod = q ** gamma
    loss = mod * ce                                      # (tile_n, 1)
    if float(alpha) != 1.0:
        loss = alpha * loss

    # Mask ragged rows of the last tile (select after the loss, before the
    # sum, so garbage rows can never poison the partial sum).
    row_ids = pid * tile_n + lax.broadcasted_iota(jnp.int32, (tn, 1), 0)
    loss = jnp.where(row_ids < n_valid, loss, 0.0)

    # One lane-dense (8,128) partial-sum block per tile; wrapper reduces.
    out_ref[...] = jnp.full(out_ref.shape, jnp.sum(loss), dtype=jnp.float32)


def focal_loss(logits, targets, *, alpha=ALPHA, gamma=GAMMA,
               reduction=REDUCTION, tile_n=None):
    """logits: (N, C) float (any float dtype); targets: (N,) int -> scalar."""
    n, c = logits.shape
    targets2d = targets.astype(jnp.int32).reshape(n, 1)

    itemsize = jnp.dtype(logits.dtype).itemsize
    if tile_n is None:
        tile_n = _choose_tile_n(n, c, itemsize)
    tile_n = max(8, int(tile_n))
    num_tiles = pl.cdiv(n, tile_n)

    # VMEM budget: double-buffered input blocks + ~6 f32-sized in-kernel temps.
    est_vmem = tile_n * c * (2 * itemsize + 6 * 4) + tile_n * 4 * 2 + (1 << 20)
    vmem_limit = int(min(max(est_vmem + (8 << 20), 20 << 20), 48 << 20))

    kernel = functools.partial(
        _focal_loss_kernel, n_valid=n, tile_n=tile_n,
        alpha=float(alpha), gamma=float(gamma))

    partials = pl.pallas_call(
        kernel,
        out_shape=jax.ShapeDtypeStruct((num_tiles, 8, 128), jnp.float32),
        grid_spec=pltpu.PrefetchScalarGridSpec(
            num_scalar_prefetch=0,
            grid=(num_tiles,),
            in_specs=[
                pl.BlockSpec((tile_n, c), lambda i: (i, 0)),   # logits stream
                pl.BlockSpec((tile_n, 1), lambda i: (i, 0)),   # targets stream
            ],
            out_specs=pl.BlockSpec((1, 8, 128), lambda i: (i, 0, 0)),
        ),
        compiler_params=pltpu.CompilerParams(
            # No cross-tile state -> megacore-shardable batch-tile axis (v7x).
            dimension_semantics=("parallel",),
            vmem_limit_bytes=vmem_limit,
        ),
    )(logits, targets2d)

    total = jnp.sum(partials[:, 0, 0])
    if reduction == "mean":
        total = total / n
    return total


def focal_loss_ref(logits, targets, *, alpha=ALPHA, gamma=GAMMA,
                   reduction=REDUCTION):
    logp = jax.nn.log_softmax(logits.astype(jnp.float32), axis=1)
    ce = -jnp.take_along_axis(logp, targets[:, None].astype(jnp.int32), axis=1)[:, 0]
    p = jnp.exp(-ce)
    loss = alpha * (1.0 - p) ** gamma * ce
    return loss.mean() if reduction == "mean" else loss.sum()


if __name__ == "__main__":
    key = jax.random.PRNGKey(0)
    k1, k2, k3, k4 = jax.random.split(key, 4)

    # Case 1: small toy shape (single ragged tile, f32, auto tile size).
    N, C = 8, 32
    logits = jax.random.normal(k1, (N, C), dtype=jnp.float32)
    targets = jax.random.randint(k2, (N,), 0, C, dtype=jnp.int32)
    out = jax.block_until_ready(focal_loss(logits, targets))
    ref = focal_loss_ref(logits, targets)
    assert jnp.allclose(out, ref, atol=1e-3, rtol=1e-3), (out, ref)

    # Case 2: bf16 streaming, multiple tiles, ragged last tile (no padding).
    N2, C2 = 50, 128
    logits2 = jax.random.normal(k3, (N2, C2), dtype=jnp.float32).astype(jnp.bfloat16)
    targets2 = jax.random.randint(k4, (N2,), 0, C2, dtype=jnp.int32)
    out2 = jax.block_until_ready(focal_loss(logits2, targets2, tile_n=32))
    ref2 = focal_loss_ref(logits2, targets2)
    assert jnp.allclose(out2, ref2, atol=1e-3, rtol=1e-3), (out2, ref2)

    print("KERNEL_OK")
</pallas_src>

<mosaic_0001>
module attributes {stable_mosaic.version = 11 : i64} {
  func.func @_focal_loss_kernel(%arg0: i32, %arg1: memref<32x32xf32, #tpu.memory_space<vmem>>, %arg2: memref<32x1xi32, #tpu.memory_space<vmem>>, %arg3: memref<1x8x128xf32, #tpu.memory_space<vmem>>) attributes {dimension_semantics = [#tpu.dimension_semantics<parallel>], iteration_bounds = array<i64: 1>, scalar_prefetch = 0 : i64, scratch_operands = 0 : i64, tpu.core_type = #tpu.core_type<tc>, window_params = [{transform_indices = @transform_0, window_bounds = array<i64: 32, 32>}, {transform_indices = @transform_1, window_bounds = array<i64: 32, 1>}, {transform_indices = @transform_2, window_bounds = array<i64: 1, 8, 128>}]} {
    %c0 = arith.constant 0 : index
    %c0_0 = arith.constant 0 : index
    %0 = vector.load %arg1[%c0, %c0_0] : memref<32x32xf32, #tpu.memory_space<vmem>>, vector<32x32xf32>
    %c0_1 = arith.constant 0 : index
    %c0_2 = arith.constant 0 : index
    %1 = vector.load %arg2[%c0_1, %c0_2] : memref<32x1xi32, #tpu.memory_space<vmem>>, vector<32x1xi32>
    %cst = arith.constant dense<0xFF800000> : vector<32xf32>
    %2 = vector.multi_reduction <maximumf>, %0, %cst [1] : vector<32x32xf32> to vector<32xf32>
    %3 = vector.shape_cast %2 : vector<32xf32> to vector<32x1xf32>
    %4 = vector.broadcast %3 : vector<32x1xf32> to vector<32x32xf32>
    %5 = arith.subf %0, %4 : vector<32x32xf32>
    %6 = math.exp %5 : vector<32x32xf32>
    %cst_3 = arith.constant dense<0.000000e+00> : vector<32xf32>
    %7 = vector.multi_reduction <add>, %6, %cst_3 [1] : vector<32x32xf32> to vector<32xf32>
    %8 = vector.shape_cast %7 : vector<32xf32> to vector<32x1xf32>
    %9 = tpu.iota {dimensions = array<i32: 1>} : vector<32x32xi32>
    %10 = vector.broadcast %1 : vector<32x1xi32> to vector<32x32xi32>
    %11 = arith.cmpi eq, %9, %10 : vector<32x32xi32>
    %cst_4 = arith.constant 0.000000e+00 : f32
    %12 = vector.broadcast %cst_4 : f32 to vector<32x32xf32>
    %13 = arith.select %11, %5, %12 : vector<32x32xi1>, vector<32x32xf32>
    %cst_5 = arith.constant dense<0.000000e+00> : vector<32xf32>
    %14 = vector.multi_reduction <add>, %13, %cst_5 [1] : vector<32x32xf32> to vector<32xf32>
    %15 = vector.shape_cast %14 : vector<32xf32> to vector<32x1xf32>
    %16 = math.log %8 : vector<32x1xf32>
    %17 = arith.subf %16, %15 : vector<32x1xf32>
    %cst_6 = arith.constant 0.000000e+00 : f32
    %18 = vector.broadcast %cst_6 : f32 to vector<32x1xf32>
    %19 = arith.subf %18, %17 : vector<32x1xf32>
    %20 = math.exp %19 : vector<32x1xf32>
    %cst_7 = arith.constant 1.000000e+00 : f32
    %21 = vector.broadcast %cst_7 : f32 to vector<32x1xf32>
    %22 = arith.subf %21, %20 : vector<32x1xf32>
    %23 = arith.mulf %22, %22 : vector<32x1xf32>
    %24 = arith.mulf %23, %17 : vector<32x1xf32>
    %c32_i32 = arith.constant 32 : i32
    %25 = arith.muli %arg0, %c32_i32 : i32
    %26 = tpu.iota {dimensions = array<i32: 0>} : vector<32x1xi32>
    %27 = vector.broadcast %25 : i32 to vector<32x1xi32>
    %28 = arith.addi %27, %26 : vector<32x1xi32>
    %c8_i32 = arith.constant 8 : i32
    %29 = vector.broadcast %c8_i32 : i32 to vector<32x1xi32>
    %30 = arith.cmpi slt, %28, %29 : vector<32x1xi32>
    %cst_8 = arith.constant 0.000000e+00 : f32
    %31 = vector.broadcast %cst_8 : f32 to vector<32x1xf32>
    %32 = arith.select %30, %24, %31 : vector<32x1xi1>, vector<32x1xf32>
    %33 = vector.shape_cast %32 : vector<32x1xf32> to vector<1x32x1xf32>
    %cst_9 = arith.constant dense<0.000000e+00> : vector<1xf32>
    %34 = vector.multi_reduction <add>, %33, %cst_9 [1, 2] : vector<1x32x1xf32> to vector<1xf32>
    %35 = vector.shape_cast %34 : vector<1xf32> to vector<1x1x1xf32>
    %36 = vector.extract %35[0, 0, 0] : f32 from vector<1x1x1xf32>
    %37 = vector.broadcast %36 : f32 to vector<1x8x128xf32>
    %c0_10 = arith.constant 0 : index
    %c0_11 = arith.constant 0 : index
    %c0_12 = arith.constant 0 : index
    %38 = vector.load %arg3[%c0_10, %c0_11, %c0_12] : memref<1x8x128xf32, #tpu.memory_space<vmem>>, vector<1x8x128xf32>
    tpu.vector_store %arg3[%c0_10, %c0_11, %c0_12], %37 {strides = array<i32>} : memref<1x8x128xf32, #tpu.memory_space<vmem>>, vector<1x8x128xf32>,
    return
  }
  func.func @transform_0(%arg0: i32) -> (i32, i32) {
    %c0_i32 = arith.constant 0 : i32
    %c0_i32_0 = arith.constant 0 : i32
    return %arg0, %c0_i32 : i32, i32
  }
  func.func @transform_1(%arg0: i32) -> (i32, i32) {
    %c0_i32 = arith.constant 0 : i32
    %c0_i32_0 = arith.constant 0 : i32
    return %arg0, %c0_i32 : i32, i32
  }
  func.func @transform_2(%arg0: i32) -> (i32, i32, i32) {
    %c0_i32 = arith.constant 0 : i32
    %c0_i32_0 = arith.constant 0 : i32
    %c0_i32_1 = arith.constant 0 : i32
    return %arg0, %c0_i32, %c0_i32_0 : i32, i32, i32
  }
}

</mosaic_0001>

<bundles_post_ra>
// kernel: tpu_custom_call.1
= control target key start
LH: loop header
LB: loop body
LE: loop exit
PB: predicated region body
PF: predicated region fallthrough
CT: control target
= control target key end

     0   :  { %vm20_vm0 = vcmask 261120   ;;  %s247_s0 = inlined_call_operand.vmem [shape: f32[8,32], index: 0, kind: input, shape index: {}]   ;;  %s248_s1 = inlined_call_operand.vmem [shape: s32[8,1], index: 1, kind: input, shape index: {}]   ;;  %s249_s2 = inlined_call_operand.hbm [shape: f32[1,8,128], index: 2, kind: output, shape index: {}]  }
   0x1   :  { %v12_v0 = vld [vmem:[%s247_s0] sm:$0xff] }
   0x2   :  { %7 = vsyncpa [#allocation3], 0  ;;  %v21_v1 = vsel %vm20_vm0, %v12_v0, -inf  ;;  %v218_v2 = vmov 0   ;;  %v16_v3 = vld [vmem:[%s248_s1] sm:$0xff]  ;;  %v57_v9 = vlaneseq  ;;  %vm146_vm2 = vcmask 7168  }
   0x3   :  { %185 = vset.pattern.permute.xlu0 %v218_v2  ;;  %s219_s0 = smov [#allocation2]   ;;  %s172_s15 = sshll.u32 %s249_s2, 4  ;;  %s173_s15 = int_to_ptr.hbm [resolvable:$true] %s172_s15 }
   0x4   :  { %22 = vmax.xlane.f32.xlu0 %v21_v1  ;;  %v58_v10 = vand.u32 127, %v57_v9  ;;  %s170_s1 = sshll.u32 %s219_s0, 4  ;;  %s171_s1 = int_to_ptr.vmem [resolvable:$true] %s170_s1 }
  0x18   :  { %60 = vperm.xlu0 %185, %v16_v3  }
  0x77   :  { %v23_v4 = vpop.xlane.xlu0 %22 }
  0x78   :  { %v33_v5 = vsub.f32 %v12_v0, %v23_v4 }
  0x7a   :  { %v37_v6 = vmul.f32 1.442695, %v33_v5 }
  0x7c   :  { %186 = vpow2.f32 %v37_v6 }
  0x82   :  { %v187_v7 = vpop.eup %186 }
  0x83   :  { %v45_v8 = vsel %vm20_vm0, %v187_v7, 0.0 }
  0x84   :  { %46 = vadd.xlane.f32.xlu1 %v45_v8 }
  0x8a   :  { %v61_v11 = vpop.permute.xlu0 %60 }
  0x8b   :  { %vm71_vm1 = vcmp.eq.s32.totalorder %v58_v10, %v61_v11 }
  0x8c   :  { %v75_v12 = vsel %vm71_vm1, %v33_v5, 0.0 }
  0x8d   :  { %v79_v13 = vsel %vm20_vm0, %v75_v12, 0.0 }
  0x8e   :  { %80 = vadd.xlane.f32.xlu1 %v79_v13 }
  0xf7   :  { %v47_v14 = vpop.xlane.xlu1 %46 }
  0xf8   :  { %188 = vlog2.f32 %v47_v14 }
  0xfe   :  { %v189_v15 = vpop.eup %188 }
  0xff   :  { %v92_v16 = vmul.f32 0.6931472, %v189_v15 }
 0x101   :  { %v81_v17 = vpop.xlane.xlu1 %80 }
 0x102   :  { %v99_v18 = vsub.f32 %v92_v16, %v81_v17 }
 0x104   :  { %v103_v19 = vsub.f32 0.0, %v99_v18 }
 0x106   :  { %v107_v20 = vmul.f32 1.442695, %v103_v19 }
 0x108   :  { %190 = vpow2.f32 %v107_v20 }
 0x10e   :  { %v191_v21 = vpop.eup %190 }
 0x10f   :  { %v115_v22 = vsub.f32 1.0, %v191_v21 }
 0x111   :  { %v119_v23 = vmul.f32 %v115_v22, %v115_v22 }
 0x113   :  { %v123_v24 = vmul.f32 %v119_v23, %v99_v18 }
 0x115   :  { %v147_v25 = vsel %vm146_vm2, %v123_v24, 0.0 }
 0x116   :  { %154 = vadd.xlane.f32.xlu2 %v147_v25 }
 0x189   :  { %v155_v26 = vpop.xlane.xlu2 %154 }
 0x18a   :  { %v156_v27 = vrot.slane %v155_v26, 4 }
 0x18c   :  { %v157_v28 = vadd.f32 %v156_v27, %v155_v26 }
 0x18e   :  { %v158_v29 = vrot.slane %v157_v28, 2 }
 0x190   :  { %v159_v30 = vadd.f32 %v158_v29, %v157_v28 }
 0x192   :  { %v160_v31 = vrot.slane %v159_v30, 1 }
 0x194   :  { %v161_v32 = vadd.f32 %v160_v31, %v159_v30 }
 0x196   :  { %181 = vpush %v161_v32 }
 0x1c7   :  { %s182_s16 = spop %181 }
 0x1c8   :  { %v163_v33 = vstv %s182_s16 }
 0x1c9   :  { %164 = vst [vmem:[#allocation2] sm:$0xff] %v163_v33 }
 0x1ca   :  { %175 = dma.vmem_to_hbm [thread:$0]  %s171_s1, 128, %s173_s15, [#allocation3]  }
 0x1cb   :  { %216 = dma.done.wait [#allocation3], 128  }
 0x1cc   :  { %217 = vsyncadd [#allocation3], 4294967168 }
 0x1cd   :  { %180 = vsyncpa [#allocation3], 1 }

</bundles_post_ra>
